<compile_context>
chip_gen: v5e
topology: v5e:2x2
jax: 0.10.0
libtpu: 0.0.40
codegen_flags: <defaults>
</compile_context>

<pallas_src>
import jax
import jax.numpy as jnp
from jax.experimental import pallas as pl
from jax.experimental.pallas import tpu as pltpu

HIDDEN_SIZE = 256
DEFAULT_BLOCK_B = 2048  # batch rows (lanes) per grid step


def _round_up(x, m):
    return ((x + m - 1) // m) * m


def _critic_kernel(xt_ref, w1_ref, b1_ref, w2_ref, b2_ref, w3_ref, b3_ref,
                   o_ref):
    # x^T tile: (in_dim, tb), batch on the lane axis.
    xt = xt_ref[...].astype(jnp.bfloat16)

    # Layer 1: single merged contraction over in_dim (K = state_dim + action_dim).
    h1 = jnp.dot(w1_ref[...], xt, preferred_element_type=jnp.float32)     # (H, tb)
    h1 = jnp.maximum(h1 + b1_ref[...], 0.0).astype(jnp.bfloat16)          # f32 epilogue -> bf16

    # Layer 2: bf16 MXU, f32 accumulate, f32 bias/ReLU.
    h2 = jnp.dot(w2_ref[...], h1, preferred_element_type=jnp.float32)     # (H, tb)
    h2 = jnp.maximum(h2 + b2_ref[...], 0.0)

    # Layer 3 (out_features == 1): VPU multiply + sublane reduction -> (1, tb).
    # Output stays lane-dense (no 1-lane-wide masked stores).
    out = jnp.sum(h2 * w3_ref[...], axis=0, keepdims=True) + b3_ref[...]
    o_ref[...] = out.astype(o_ref.dtype)


def _choose_batch_tile(B, block_b):
    """Large tiles for throughput; >=2 grid steps for megacore when B is big."""
    if B <= 512:
        return B                                   # single tile == full array dim
    tb = min(block_b, _round_up(pl.cdiv(B, 2), 128))  # lane dim must be /128
    return max(tb, 128)


def critic_forward(s, a, params, *, block_b=DEFAULT_BLOCK_B):
    """Pallas implementation of Critic.forward(s, a) = net(cat([s, a], -1))."""
    w1, b1, w2, b2, w3, b3 = params
    B, state_dim = s.shape
    action_dim = a.shape[1]
    in_dim = state_dim + action_dim
    hidden = w2.shape[0]

    # Fuse torch.cat in the wrapper (trivial) and present x^T so the batch
    # lands on the lane axis inside the kernel.
    xt = jnp.concatenate([s, a], axis=-1).T        # (in_dim, B), f32

    tb = _choose_batch_tile(B, block_b)
    nb = pl.cdiv(B, tb)

    const = lambda i: (0, 0)  # weights / biases: resident across all grid steps
    grid_spec = pltpu.PrefetchScalarGridSpec(
        num_scalar_prefetch=0,
        grid=(nb,),
        in_specs=[
            pl.BlockSpec((in_dim, tb), lambda i: (0, i)),   # x^T tile (streamed)
            pl.BlockSpec((hidden, in_dim), const),          # W1 (out, in)
            pl.BlockSpec((hidden, 1), const),               # b1 (column)
            pl.BlockSpec((hidden, hidden), const),          # W2
            pl.BlockSpec((hidden, 1), const),               # b2
            pl.BlockSpec((hidden, 1), const),               # w3 (column)
            pl.BlockSpec((1, 1), const),                    # b3
        ],
        out_specs=pl.BlockSpec((1, tb), lambda i: (0, i)),  # lane-dense output
    )

    out = pl.pallas_call(
        _critic_kernel,
        out_shape=jax.ShapeDtypeStruct((1, B), jnp.float32),
        grid_spec=grid_spec,
        compiler_params=pltpu.CompilerParams(
            dimension_semantics=("parallel",),  # shard batch tiles across TCs (v7x)
        ),
    )(xt, w1, b1, w2, b2, w3, b3)

    return out.reshape(B, 1)


def init_critic_params(key, state_dim, action_dim, hidden=HIDDEN_SIZE):
    """PyTorch-Linear-style init (U[-1/sqrt(fan_in), +1/sqrt(fan_in)]).

    Returns (w1, b1, w2, b2, w3, b3) in kernel layout:
      w1: (hidden, state_dim+action_dim) bf16     b1: (hidden, 1) f32
      w2: (hidden, hidden)               bf16     b2: (hidden, 1) f32
      w3: (hidden, 1)                    f32      b3: (1, 1)      f32
    """
    in_dim = state_dim + action_dim

    def linear(key, fan_in, fan_out):
        kw, kb = jax.random.split(key)
        bound = 1.0 / jnp.sqrt(fan_in)
        w = jax.random.uniform(kw, (fan_out, fan_in), jnp.float32, -bound, bound)
        b = jax.random.uniform(kb, (fan_out, 1), jnp.float32, -bound, bound)
        return w, b

    k1, k2, k3 = jax.random.split(key, 3)
    w1, b1 = linear(k1, in_dim, hidden)
    w2, b2 = linear(k2, hidden, hidden)
    w3, b3 = linear(k3, hidden, 1)

    return (w1.astype(jnp.bfloat16), b1,
            w2.astype(jnp.bfloat16), b2,
            w3.reshape(hidden, 1), b3.reshape(1, 1))


def _reference(s, a, params):
    """Pure-JAX reference mirroring the kernel's numerics (bf16 MXU, f32 acc)."""
    w1, b1, w2, b2, w3, b3 = params
    x = jnp.concatenate([s, a], axis=-1).astype(jnp.bfloat16)
    h1 = jnp.dot(x, w1.T, preferred_element_type=jnp.float32)
    h1 = jnp.maximum(h1 + b1.reshape(1, -1), 0.0).astype(jnp.bfloat16)
    h2 = jnp.dot(h1, w2.T, preferred_element_type=jnp.float32)
    h2 = jnp.maximum(h2 + b2.reshape(1, -1), 0.0)
    return jnp.sum(h2 * w3.reshape(1, -1), axis=-1, keepdims=True) + b3.reshape(1, 1)


if __name__ == "__main__":
    batch = 8
    state_dim = 12
    action_dim = 4

    key = jax.random.PRNGKey(0)
    k_s, k_a, k_p = jax.random.split(key, 3)
    s = jax.random.normal(k_s, (batch, state_dim), jnp.float32)
    a = jax.random.normal(k_a, (batch, action_dim), jnp.float32)
    params = init_critic_params(k_p, state_dim, action_dim)

    q = critic_forward(s, a, params)
    jax.block_until_ready(q)

    ref = _reference(s, a, params)
    assert q.shape == (batch, 1)
    assert jnp.allclose(q, ref, atol=1e-3, rtol=1e-3), (q, ref)

    print("KERNEL_OK")
</pallas_src>

<mosaic_0001>
module attributes {stable_mosaic.version = 11 : i64} {
  func.func @_critic_kernel(%arg0: i32, %arg1: memref<16x8xf32, #tpu.memory_space<vmem>>, %arg2: memref<256x16xbf16, #tpu.memory_space<vmem>>, %arg3: memref<256x1xf32, #tpu.memory_space<vmem>>, %arg4: memref<256x256xbf16, #tpu.memory_space<vmem>>, %arg5: memref<256x1xf32, #tpu.memory_space<vmem>>, %arg6: memref<256x1xf32, #tpu.memory_space<vmem>>, %arg7: memref<1x1xf32, #tpu.memory_space<vmem>>, %arg8: memref<1x8xf32, #tpu.memory_space<vmem>>) attributes {dimension_semantics = [#tpu.dimension_semantics<parallel>], iteration_bounds = array<i64: 1>, scalar_prefetch = 0 : i64, scratch_operands = 0 : i64, tpu.core_type = #tpu.core_type<tc>, window_params = [{transform_indices = @transform_0, window_bounds = array<i64: 16, 8>}, {pipeline_mode = #tpu.pipeline_mode<synchronous>, transform_indices = @transform_1, window_bounds = array<i64: 256, 16>}, {pipeline_mode = #tpu.pipeline_mode<synchronous>, transform_indices = @transform_2, window_bounds = array<i64: 256, 1>}, {pipeline_mode = #tpu.pipeline_mode<synchronous>, transform_indices = @transform_3, window_bounds = array<i64: 256, 256>}, {pipeline_mode = #tpu.pipeline_mode<synchronous>, transform_indices = @transform_4, window_bounds = array<i64: 256, 1>}, {pipeline_mode = #tpu.pipeline_mode<synchronous>, transform_indices = @transform_5, window_bounds = array<i64: 256, 1>}, {pipeline_mode = #tpu.pipeline_mode<synchronous>, transform_indices = @transform_6, window_bounds = array<i64: 1, 1>}, {transform_indices = @transform_7, window_bounds = array<i64: 1, 8>}]} {
    %c0 = arith.constant 0 : index
    %c0_0 = arith.constant 0 : index
    %0 = vector.load %arg1[%c0, %c0_0] : memref<16x8xf32, #tpu.memory_space<vmem>>, vector<16x8xf32>
    %1 = arith.truncf %0 : vector<16x8xf32> to vector<16x8xbf16>
    %c0_1 = arith.constant 0 : index
    %c0_2 = arith.constant 0 : index
    %2 = vector.load %arg2[%c0_1, %c0_2] : memref<256x16xbf16, #tpu.memory_space<vmem>>, vector<256x16xbf16>
    %cst = arith.constant dense<0.000000e+00> : vector<256x8xf32>
    %3 = tpu.matmul %2, %1, %cst {dimension_numbers = #tpu.dot_dimension_numbers<[1], [0], [0], [1], [0, 0, 1, 1], [], []>} : vector<256x16xbf16>, vector<16x8xbf16>, vector<256x8xf32> -> vector<256x8xf32>
    %c0_3 = arith.constant 0 : index
    %c0_4 = arith.constant 0 : index
    %4 = vector.load %arg3[%c0_3, %c0_4] : memref<256x1xf32, #tpu.memory_space<vmem>>, vector<256x1xf32>
    %5 = vector.broadcast %4 : vector<256x1xf32> to vector<256x8xf32>
    %6 = arith.addf %3, %5 : vector<256x8xf32>
    %cst_5 = arith.constant 0.000000e+00 : f32
    %7 = vector.broadcast %cst_5 : f32 to vector<256x8xf32>
    %8 = arith.maximumf %6, %7 : vector<256x8xf32>
    %9 = arith.truncf %8 : vector<256x8xf32> to vector<256x8xbf16>
    %c0_6 = arith.constant 0 : index
    %c0_7 = arith.constant 0 : index
    %10 = vector.load %arg4[%c0_6, %c0_7] : memref<256x256xbf16, #tpu.memory_space<vmem>>, vector<256x256xbf16>
    %cst_8 = arith.constant dense<0.000000e+00> : vector<256x8xf32>
    %11 = tpu.matmul %10, %9, %cst_8 {dimension_numbers = #tpu.dot_dimension_numbers<[1], [0], [0], [1], [0, 0, 1, 1], [], []>} : vector<256x256xbf16>, vector<256x8xbf16>, vector<256x8xf32> -> vector<256x8xf32>
    %c0_9 = arith.constant 0 : index
    %c0_10 = arith.constant 0 : index
    %12 = vector.load %arg5[%c0_9, %c0_10] : memref<256x1xf32, #tpu.memory_space<vmem>>, vector<256x1xf32>
    %13 = vector.broadcast %12 : vector<256x1xf32> to vector<256x8xf32>
    %14 = arith.addf %11, %13 : vector<256x8xf32>
    %cst_11 = arith.constant 0.000000e+00 : f32
    %15 = vector.broadcast %cst_11 : f32 to vector<256x8xf32>
    %16 = arith.maximumf %14, %15 : vector<256x8xf32>
    %c0_12 = arith.constant 0 : index
    %c0_13 = arith.constant 0 : index
    %17 = vector.load %arg6[%c0_12, %c0_13] : memref<256x1xf32, #tpu.memory_space<vmem>>, vector<256x1xf32>
    %18 = vector.broadcast %17 : vector<256x1xf32> to vector<256x8xf32>
    %19 = arith.mulf %16, %18 : vector<256x8xf32>
    %cst_14 = arith.constant dense<0.000000e+00> : vector<8xf32>
    %20 = vector.multi_reduction <add>, %19, %cst_14 [0] : vector<256x8xf32> to vector<8xf32>
    %21 = vector.shape_cast %20 : vector<8xf32> to vector<1x8xf32>
    %c0_15 = arith.constant 0 : index
    %c0_16 = arith.constant 0 : index
    %22 = vector.load %arg7[%c0_15, %c0_16] : memref<1x1xf32, #tpu.memory_space<vmem>>, vector<1x1xf32>
    %23 = vector.broadcast %22 : vector<1x1xf32> to vector<1x8xf32>
    %24 = arith.addf %21, %23 : vector<1x8xf32>
    %c0_17 = arith.constant 0 : index
    %c0_18 = arith.constant 0 : index
    %25 = vector.load %arg8[%c0_17, %c0_18] : memref<1x8xf32, #tpu.memory_space<vmem>>, vector<1x8xf32>
    tpu.vector_store %arg8[%c0_17, %c0_18], %24 {strides = array<i32>} : memref<1x8xf32, #tpu.memory_space<vmem>>, vector<1x8xf32>,
    return
  }
  func.func @transform_0(%arg0: i32) -> (i32, i32) {
    %c0_i32 = arith.constant 0 : i32
    %c0_i32_0 = arith.constant 0 : i32
    return %c0_i32, %arg0 : i32, i32
  }
  func.func @transform_1(%arg0: i32) -> (i32, i32) {
    %c0_i32 = arith.constant 0 : i32
    %c0_i32_0 = arith.constant 0 : i32
    %c0_i32_1 = arith.constant 0 : i32
    return %c0_i32, %c0_i32_0 : i32, i32
  }
  func.func @transform_2(%arg0: i32) -> (i32, i32) {
    %c0_i32 = arith.constant 0 : i32
    %c0_i32_0 = arith.constant 0 : i32
    %c0_i32_1 = arith.constant 0 : i32
    return %c0_i32, %c0_i32_0 : i32, i32
  }
  func.func @transform_3(%arg0: i32) -> (i32, i32) {
    %c0_i32 = arith.constant 0 : i32
    %c0_i32_0 = arith.constant 0 : i32
    %c0_i32_1 = arith.constant 0 : i32
    return %c0_i32, %c0_i32_0 : i32, i32
  }
  func.func @transform_4(%arg0: i32) -> (i32, i32) {
    %c0_i32 = arith.constant 0 : i32
    %c0_i32_0 = arith.constant 0 : i32
    %c0_i32_1 = arith.constant 0 : i32
    return %c0_i32, %c0_i32_0 : i32, i32
  }
  func.func @transform_5(%arg0: i32) -> (i32, i32) {
    %c0_i32 = arith.constant 0 : i32
    %c0_i32_0 = arith.constant 0 : i32
    %c0_i32_1 = arith.constant 0 : i32
    return %c0_i32, %c0_i32_0 : i32, i32
  }
  func.func @transform_6(%arg0: i32) -> (i32, i32) {
    %c0_i32 = arith.constant 0 : i32
    %c0_i32_0 = arith.constant 0 : i32
    %c0_i32_1 = arith.constant 0 : i32
    return %c0_i32, %c0_i32_0 : i32, i32
  }
  func.func @transform_7(%arg0: i32) -> (i32, i32) {
    %c0_i32 = arith.constant 0 : i32
    %c0_i32_0 = arith.constant 0 : i32
    return %c0_i32, %arg0 : i32, i32
  }
}

</mosaic_0001>

<bundles_post_ra>
// kernel: tpu_custom_call.1
= control target key start
LH: loop header
LB: loop body
LE: loop exit
PB: predicated region body
PF: predicated region fallthrough
CT: control target
= control target key end

     0   :  { %s2620_s0 = inlined_call_operand.vmem [shape: f32[16,8], index: 0, kind: input, shape index: {}]   ;;  %s2621_s1 = inlined_call_operand.vmem [shape: bf16[256,16], index: 1, kind: input, shape index: {}]   ;;  %s2622_s2 = inlined_call_operand.vmem [shape: f32[256,1], index: 2, kind: input, shape index: {}]   ;;  %s2623_s3 = inlined_call_operand.vmem [shape: bf16[256,256], index: 3, kind: input, shape index: {}]   ;;  %s2624_s4 = inlined_call_operand.vmem [shape: f32[256,1], index: 4, kind: input, shape index: {}]   ;;  %s2625_s5 = inlined_call_operand.vmem [shape: f32[256,1], index: 5, kind: input, shape index: {}]   ;;  %s2626_s6 = inlined_call_operand.<no memory space> [shape: f32[1,1], index: 6, kind: input, shape index: {}]   ;;  %s2627_s7 = inlined_call_operand.hbm [shape: f32[1,8], index: 7, kind: output, shape index: {}]  }
   0x1   :  { %v12_v0 = vstv %s2626_s6 }
   0x2   :  { %13 = vst [vmem:[#allocation2] sm:$0x1] %v12_v0 }
   0x3   :  { %v69_v1 = vld [vmem:[%s2622_s2 + $0x20] sm:$0xff]  ;;  %v67_v2 = vld [vmem:[%s2622_s2 + $0x10] sm:$0xff]  ;;  %v1741_v4 = vmov 0   ;;  %v31_v6 = vld [vmem:[%s2620_s0 + $0x8] sm:$0xff]  ;;  %vm337_vm0 = vcmask 130048  }
   0x4   :  { %v65_v3 = vld [vmem:[%s2622_s2] sm:$0xff]  ;;  %1714 = vset.pattern.permute.xlu2 %v1741_v4  ;;  %1713 = vset.pattern.permute.xlu1 %v1741_v4 }
   0x5   :  { %v30_v5 = vld [vmem:[%s2620_s0] sm:$0xff]  ;;  %1712 = vset.pattern.permute.xlu0 %v1741_v4  ;;  %119 = vperm.xlu2 %1714, %v69_v1  }
   0x6   :  { %v32_v7 = vpack.c.bf16 %v31_v6, %v30_v5  ;;  %109 = vperm.xlu1 %1713, %v67_v2   ;;  %99 = vperm.xlu0 %1712, %v65_v3   ;;  %v1645_v8 = vld [vmem:[%s2621_s1] sm:$0xff] }
   0x8   :  { %393 = vmatpush.bf16.msra.mxu0 %v32_v7  ;;  %1693 = vmatpush.bf16.msra.mxu3 %v32_v7 }
   0x9   :  { %14 = vsyncpa [#allocation4], 0  ;;  %v70_v9 = vld [vmem:[%s2622_s2 + $0x28] sm:$0xff]  ;;  %v68_v10 = vld [vmem:[%s2622_s2 + $0x18] sm:$0xff]  ;;  %vm1341_vm1 = vcmask 64512   ;;  %s1428_s9 = sshll.u32 %s2627_s7, 4  ;;  %s1429_s9 = int_to_ptr.hbm [resolvable:$true] %s1428_s9 }
   0xa   :  { %v66_v11 = vld [vmem:[%s2622_s2 + $0x8] sm:$0xff]  ;;  %v73_v12 = vld [vmem:[%s2622_s2 + $0x40] sm:$0xff]  ;;  %v72_v13 = vld [vmem:[%s2622_s2 + $0x38] sm:$0xff]  ;;  %vm1419_vm2 = vcmask 57344  }
   0xb   :  { %1501 = vmatmul.msk.bf16.vlgmr.msra.gmra.mxu0 %vm337_vm0, %v1645_v8  ;;  %v71_v14 = vld [vmem:[%s2622_s2 + $0x30] sm:$0xff]  ;;  %v1646_v15 = vld [vmem:[%s2621_s1 + $0x8] sm:$0xff]  ;;  %v76_v16 = vld [vmem:[%s2622_s2 + $0x58] sm:$0xff] }
   0xc   :  { %v75_v17 = vld [vmem:[%s2622_s2 + $0x50] sm:$0xff]  ;;  %v74_v18 = vld [vmem:[%s2622_s2 + $0x48] sm:$0xff]  ;;  %v77_v21 = vld [vmem:[%s2622_s2 + $0x60] sm:$0xff] }
   0xd   :  { %124 = vperm.xlu2 %1714, %v70_v9   ;;  %v79_v19 = vld [vmem:[%s2622_s2 + $0x70] sm:$0xff]  ;;  %v78_v20 = vld [vmem:[%s2622_s2 + $0x68] sm:$0xff]  ;;  %v81_v25 = vld [vmem:[%s2622_s2 + $0x80] sm:$0xff] }
   0xe   :  { %114 = vperm.xlu1 %1713, %v68_v10   ;;  %104 = vperm.xlu0 %1712, %v66_v11   ;;  %v1647_v22 = vld [vmem:[%s2621_s1 + $0x10] sm:$0xff]  ;;  %v1658_v23 = vld [vmem:[%s2621_s1 + $0x68] sm:$0xff]  ;;  %v80_v26 = vld [vmem:[%s2622_s2 + $0x78] sm:$0xff] }
   0xf   :  { %1514 = vmatmul.msk.bf16.vlgmr.msra.gmra.mxu3 %vm337_vm0, %v1658_v23  ;;  %v82_v24 = vld [vmem:[%s2622_s2 + $0x88] sm:$0xff]  ;;  %v85_v27 = vld [vmem:[%s2622_s2 + $0xa0] sm:$0xff]  ;;  %v84_v28 = vld [vmem:[%s2622_s2 + $0x98] sm:$0xff] }
  0x10   :  { %v83_v29 = vld [vmem:[%s2622_s2 + $0x90] sm:$0xff]  ;;  %v1648_v30 = vld [vmem:[%s2621_s1 + $0x18] sm:$0xff]  ;;  %v86_v34 = vld [vmem:[%s2622_s2 + $0xa8] sm:$0xff] }
  0x11   :  { %v1659_v31 = vld [vmem:[%s2621_s1 + $0x70] sm:$0xff]  ;;  %v88_v32 = vld [vmem:[%s2622_s2 + $0xb8] sm:$0xff]  ;;  %v89_v37 = vld [vmem:[%s2622_s2 + $0xc0] sm:$0xff] }
  0x12   :  { %v87_v33 = vld [vmem:[%s2622_s2 + $0xb0] sm:$0xff]  ;;  %v96_v35 = vld [vmem:[%s2622_s2 + $0xf8] sm:$0xff]  ;;  %v1649_v38 = vld [vmem:[%s2621_s1 + $0x20] sm:$0xff] }
  0x13   :  { %v95_v36 = vld [vmem:[%s2622_s2 + $0xf0] sm:$0xff]  ;;  %v1660_v39 = vld [vmem:[%s2621_s1 + $0x78] sm:$0xff]  ;;  %v94_v41 = vld [vmem:[%s2622_s2 + $0xe8] sm:$0xff] }
  0x14   :  { %v91_v40 = vld [vmem:[%s2622_s2 + $0xd0] sm:$0xff]  ;;  %v93_v42 = vld [vmem:[%s2622_s2 + $0xe0] sm:$0xff]  ;;  %v90_v44 = vld [vmem:[%s2622_s2 + $0xc8] sm:$0xff] }
  0x15   :  { %139 = vperm.xlu2 %1714, %v73_v12   ;;  %v555_v43 = vld [vmem:[%s2624_s4] sm:$0xff]  ;;  %v92_v45 = vld [vmem:[%s2622_s2 + $0xd8] sm:$0xff]  ;;  %v1650_v46 = vld [vmem:[%s2621_s1 + $0x28] sm:$0xff] }
  0x16   :  { %134 = vperm.xlu1 %1713, %v72_v13   ;;  %129 = vperm.xlu0 %1712, %v71_v14   ;;  %v558_v47 = vld [vmem:[%s2624_s4 + $0x18] sm:$0xff]  ;;  %v557_v48 = vld [vmem:[%s2624_s4 + $0x10] sm:$0xff]  ;;  %v556_v49 = vld [vmem:[%s2624_s4 + $0x8] sm:$0xff] }
  0x17   :  { %v561_v50 = vld [vmem:[%s2624_s4 + $0x30] sm:$0xff]  ;;  %v560_v51 = vld [vmem:[%s2624_s4 + $0x28] sm:$0xff]  ;;  %v559_v52 = vld [vmem:[%s2624_s4 + $0x20] sm:$0xff] }
  0x18   :  { %v1651_v53 = vld [vmem:[%s2621_s1 + $0x30] sm:$0xff]  ;;  %v564_v54 = vld [vmem:[%s2624_s4 + $0x48] sm:$0xff]  ;;  %v563_v55 = vld [vmem:[%s2624_s4 + $0x40] sm:$0xff] }
  0x19   :  { %v562_v56 = vld [vmem:[%s2624_s4 + $0x38] sm:$0xff]  ;;  %v567_v57 = vld [vmem:[%s2624_s4 + $0x60] sm:$0xff]  ;;  %v565_v59 = vld [vmem:[%s2624_s4 + $0x50] sm:$0xff] }
  0x1a   :  { %v566_v58 = vld [vmem:[%s2624_s4 + $0x58] sm:$0xff]  ;;  %v569_v0 = vld [vmem:[%s2624_s4 + $0x70] sm:$0xff]  ;;  %v568_v1 = vld [vmem:[%s2624_s4 + $0x68] sm:$0xff] }
  0x1b   :  { %1502 = vmatmul.msk.bf16.gmra.mxu0 %vm337_vm0, %v1646_v15  ;;  %v1652_v60 = vld [vmem:[%s2621_s1 + $0x38] sm:$0xff]  ;;  %v573_v4 = vld [vmem:[%s2624_s4 + $0x90] sm:$0xff]  ;;  %v572_v6 = vld [vmem:[%s2624_s4 + $0x88] sm:$0xff] }
  0x1c   :  { %v570_v63 = vld [vmem:[%s2624_s4 + $0x78] sm:$0xff]  ;;  %v571_v7 = vld [vmem:[%s2624_s4 + $0x80] sm:$0xff]  ;;  %v576_v13 = vld [vmem:[%s2624_s4 + $0xa8] sm:$0xff] }
  0x1d   :  { %154 = vperm.xlu2 %1714, %v76_v16   ;;  %v1653_v9 = vld [vmem:[%s2621_s1 + $0x40] sm:$0xff]  ;;  %v574_v15 = vld [vmem:[%s2624_s4 + $0x98] sm:$0xff] }
  0x1e   :  { %149 = vperm.xlu1 %1713, %v75_v17   ;;  %144 = vperm.xlu0 %1712, %v74_v18   ;;  %v575_v14 = vld [vmem:[%s2624_s4 + $0xa0] sm:$0xff] }
  0x1f   :  { %1515 = vmatmul.msk.bf16.gmra.mxu3 %vm337_vm0, %v1659_v31  ;;  %v579_v23 = vld [vmem:[%s2624_s4 + $0xc0] sm:$0xff] }
  0x25   :  { %169 = vperm.xlu2 %1714, %v79_v19  }
  0x26   :  { %164 = vperm.xlu1 %1713, %v78_v20   ;;  %159 = vperm.xlu0 %1712, %v77_v21  }
  0x2b   :  { %1503 = vmatmul.msk.bf16.gmra.mxu0 %vm337_vm0, %v1647_v22 }
  0x2d   :  { %184 = vperm.xlu2 %1714, %v82_v24   ;;  %v578_v24 = vld [vmem:[%s2624_s4 + $0xb8] sm:$0xff] }
  0x2e   :  { %179 = vperm.xlu1 %1713, %v81_v25   ;;  %174 = vperm.xlu0 %1712, %v80_v26   ;;  %v577_v25 = vld [vmem:[%s2624_s4 + $0xb0] sm:$0xff] }
  0x2f   :  { %1516 = vmatmul.msk.bf16.gmra.mxu3 %vm337_vm0, %v1660_v39 }
  0x35   :  { %199 = vperm.xlu2 %1714, %v85_v27   ;;  %v1654_v27 = vld [vmem:[%s2621_s1 + $0x48] sm:$0xff] }
  0x36   :  { %194 = vperm.xlu1 %1713, %v84_v28   ;;  %189 = vperm.xlu0 %1712, %v83_v29  }
  0x3b   :  { %1504 = vmatmul.msk.bf16.gmra.mxu0 %vm337_vm0, %v1648_v30 }
  0x3d   :  { %214 = vperm.xlu2 %1714, %v88_v32   ;;  %v582_v32 = vld [vmem:[%s2624_s4 + $0xd8] sm:$0xff] }
  0x3e   :  { %209 = vperm.xlu1 %1713, %v87_v33   ;;  %204 = vperm.xlu0 %1712, %v86_v34   ;;  %v581_v34 = vld [vmem:[%s2624_s4 + $0xd0] sm:$0xff] }
  0x45   :  { %254 = vperm.xlu2 %1714, %v96_v35   ;;  %v580_v35 = vld [vmem:[%s2624_s4 + $0xc8] sm:$0xff] }
  0x46   :  { %249 = vperm.xlu1 %1713, %v95_v36   ;;  %219 = vperm.xlu0 %1712, %v89_v37  }
  0x4b   :  { %1505 = vmatmul.msk.bf16.gmra.mxu0 %vm337_vm0, %v1649_v38 }
  0x4d   :  { %229 = vperm.xlu2 %1714, %v91_v40  }
  0x4e   :  { %244 = vperm.xlu1 %1713, %v94_v41   ;;  %239 = vperm.xlu0 %1712, %v93_v42   ;;  %v585_v41 = vld [vmem:[%s2624_s4 + $0xf0] sm:$0xff]  ;;  %v584_v42 = vld [vmem:[%s2624_s4 + $0xe8] sm:$0xff] }
  0x55   :  { %589 = vperm.xlu2 %1714, %v555_v43   ;;  %v583_v43 = vld [vmem:[%s2624_s4 + $0xe0] sm:$0xff] }
  0x56   :  { %224 = vperm.xlu1 %1713, %v90_v44   ;;  %234 = vperm.xlu0 %1712, %v92_v45  }
  0x5b   :  { %1506 = vmatmul.msk.bf16.gmra.mxu0 %vm337_vm0, %v1650_v46 }
  0x5d   :  { %604 = vperm.xlu2 %1714, %v558_v47   ;;  %v1655_v47 = vld [vmem:[%s2621_s1 + $0x50] sm:$0xff] }
  0x5e   :  { %599 = vperm.xlu1 %1713, %v557_v48   ;;  %594 = vperm.xlu0 %1712, %v556_v49   ;;  %v1118_v49 = vld [vmem:[%s2625_s5 + $0x8] sm:$0xff] }
  0x5f   :  { %v1980_v2 = vpop.permute.xlu2 %119 }
  0x65   :  { %619 = vperm.xlu2 %1714, %v561_v50  }
  0x66   :  { %614 = vperm.xlu1 %1713, %v560_v51   ;;  %609 = vperm.xlu0 %1712, %v559_v52   ;;  %v1117_v51 = vld [vmem:[%s2625_s5] sm:$0xff]  ;;  %v586_v52 = vld [vmem:[%s2624_s4 + $0xf8] sm:$0xff] }
  0x67   :  { %v1991_v8 = vpop.permute.xlu2 %124 }
  0x6b   :  { %1507 = vmatmul.msk.bf16.gmra.mxu0 %vm337_vm0, %v1651_v53 }
  0x6d   :  { %634 = vperm.xlu2 %1714, %v564_v54  }
  0x6e   :  { %629 = vperm.xlu1 %1713, %v563_v55   ;;  %624 = vperm.xlu0 %1712, %v562_v56  }
  0x6f   :  { %v2010_v18 = vpop.permute.xlu2 %139 }
  0x75   :  { %649 = vperm.xlu2 %1714, %v567_v57  }
  0x76   :  { %644 = vperm.xlu1 %1713, %v566_v58   ;;  %639 = vperm.xlu0 %1712, %v565_v59  }
  0x77   :  { %v2030_v31 = vpop.permute.xlu2 %154 }
  0x78   :  { %v100_v61 = vpop.permute.xlu0 %99  ;;  %v110_v62 = vpop.permute.xlu1 %109 }
  0x7b   :  { %1508 = vmatmul.msk.bf16.gmra.mxu0 %vm337_vm0, %v1652_v60 }
  0x7d   :  { %664 = vperm.xlu2 %1714, %v570_v63   ;;  %v1119_v63 = vld [vmem:[%s2625_s5 + $0x10] sm:$0xff] }
  0x7e   :  { %659 = vperm.xlu1 %1713, %v569_v0   ;;  %654 = vperm.xlu0 %1712, %v568_v1  }
  0x7f   :  { %v2055_v44 = vpop.permute.xlu2 %169 }
  0x80   :  { %v105_v3 = vpop.permute.xlu0 %104  ;;  %v115_v5 = vpop.permute.xlu1 %114 }
  0x85   :  { %679 = vperm.xlu2 %1714, %v573_v4  }
  0x86   :  { %674 = vperm.xlu1 %1713, %v572_v6   ;;  %669 = vperm.xlu0 %1712, %v571_v7  }
  0x87   :  { %v2078_v54 = vpop.permute.xlu2 %184 }
  0x88   :  { %v395_v10 = vpop.f32.mrf.mxu0  ;;  %v1996_v12 = vpop.permute.xlu0 %129 }
  0x89   :  { %v396_v11 = vadd.f32 %v395_v10, %v100_v61  ;;  %v2008_v16 = vpop.permute.xlu1 %134  ;;  %v1121_v61 = vld [vmem:[%s2625_s5 + $0x20] sm:$0xff]  ;;  %v1122_v10 = vld [vmem:[%s2625_s5 + $0x28] sm:$0xff] }
  0x8b   :  { %1509 = vmatmul.msk.bf16.gmra.mxu0 %vm337_vm0, %v1653_v9  ;;  %v475_v21 = vmax.f32 %v396_v11, 0.0  ;;  %v1123_v9 = vld [vmem:[%s2625_s5 + $0x30] sm:$0xff] }
  0x8d   :  { %694 = vperm.xlu2 %1714, %v576_v13  }
  0x8e   :  { %689 = vperm.xlu1 %1713, %v575_v14   ;;  %684 = vperm.xlu0 %1712, %v574_v15  }
  0x90   :  { %v397_v17 = vpop.f32.mrf.mxu0  ;;  %v2012_v20 = vpop.permute.xlu0 %144 }
  0x91   :  { %v398_v19 = vadd.f32 %v397_v17, %v105_v3  ;;  %v2028_v28 = vpop.permute.xlu1 %149  ;;  %v1656_v3 = vld [vmem:[%s2621_s1 + $0x58] sm:$0xff] }
  0x92   :  { %v2076_v53 = vpop.f32.mrf.mxu3 }
  0x93   :  { %v476_v22 = vmax.f32 %v398_v19, 0.0 }
  0x95   :  { %v2023_v26 = vpack.c.bf16 %v476_v22, %v475_v21  ;;  %709 = vperm.xlu2 %1714, %v579_v23   ;;  %v1127_v21 = vld [vmem:[%s2625_s5 + $0x50] sm:$0xff]  ;;  %v1126_v23 = vld [vmem:[%s2625_s5 + $0x48] sm:$0xff] }
  0x96   :  { %704 = vperm.xlu1 %1713, %v578_v24   ;;  %699 = vperm.xlu0 %1712, %v577_v25   ;;  %v1125_v24 = vld [vmem:[%s2625_s5 + $0x40] sm:$0xff] }
  0x98   :  { %v400_v29 = vpop.f32.mrf.mxu0  ;;  %v2036_v33 = vpop.permute.xlu0 %159 }
  0x99   :  { %v401_v30 = vadd.f32 %v400_v29, %v110_v62  ;;  %v2044_v38 = vpop.permute.xlu1 %164  ;;  %v1120_v62 = vld [vmem:[%s2625_s5 + $0x18] sm:$0xff] }
  0x9a   :  { %v2093_v0 = vpop.f32.mrf.mxu3 }
  0x9b   :  { %1510 = vmatmul.msk.bf16.gmra.mxu0 %vm337_vm0, %v1654_v27  ;;  %v477_v39 = vmax.f32 %v401_v30, 0.0  ;;  %v1657_v27 = vld [vmem:[%s2621_s1 + $0x60] sm:$0xff] }
  0x9d   :  { %724 = vperm.xlu2 %1714, %v582_v32   ;;  %v1130_v32 = vld [vmem:[%s2625_s5 + $0x68] sm:$0xff] }
  0x9e   :  { %719 = vperm.xlu1 %1713, %v581_v34   ;;  %714 = vperm.xlu0 %1712, %v580_v35   ;;  %v1129_v34 = vld [vmem:[%s2625_s5 + $0x60] sm:$0xff]  ;;  %v1128_v35 = vld [vmem:[%s2625_s5 + $0x58] sm:$0xff] }
  0xa0   :  { %v402_v36 = vpop.f32.mrf.mxu0  ;;  %v2059_v46 = vpop.permute.xlu0 %174 }
  0xa1   :  { %v403_v37 = vadd.f32 %v402_v36, %v115_v5  ;;  %v2068_v50 = vpop.permute.xlu1 %179  ;;  %v2102_v5 = vpop.permute.xlu2 %199 }
  0xa2   :  { %v465_v11 = vpop.f32.mrf.mxu3 }
  0xa3   :  { %v478_v40 = vmax.f32 %v403_v37, 0.0 }
  0xa5   :  { %v2057_v45 = vpack.c.bf16 %v478_v40, %v477_v39  ;;  %739 = vperm.xlu2 %1714, %v585_v41  }
  0xa6   :  { %734 = vperm.xlu1 %1713, %v584_v42   ;;  %729 = vperm.xlu0 %1712, %v583_v43  }
  0xa8   :  { %v405_v48 = vpop.f32.mrf.mxu0  ;;  %v2081_v56 = vpop.permute.xlu0 %189 }
  0xa9   :  { %v406_v55 = vadd.f32 %v405_v48, %v1980_v2  ;;  %v2097_v2 = vpop.permute.xlu1 %194  ;;  %v2120_v15 = vpop.permute.xlu2 %214 }
  0xaa   :  { %v467_v25 = vpop.f32.mrf.mxu3 }
  0xab   :  { %1511 = vmatmul.msk.bf16.gmra.mxu0 %vm337_vm0, %v1655_v47  ;;  %v479_v59 = vmax.f32 %v406_v55, 0.0 }
  0xad   :  { %1156 = vperm.xlu2 %1714, %v1118_v49   ;;  %v1133_v49 = vld [vmem:[%s2625_s5 + $0x80] sm:$0xff] }
  0xae   :  { %1151 = vperm.xlu1 %1713, %v1117_v51   ;;  %744 = vperm.xlu0 %1712, %v586_v52   ;;  %v1132_v52 = vld [vmem:[%s2625_s5 + $0x78] sm:$0xff] }
  0xb0   :  { %v407_v57 = vpop.f32.mrf.mxu0  ;;  %v2105_v7 = vpop.permute.xlu0 %204 }
  0xb1   :  { %v408_v58 = vadd.f32 %v407_v57, %v1991_v8  ;;  %v1124_v8 = vld [vmem:[%s2625_s5 + $0x38] sm:$0xff]  ;;  %v255_v37 = vpop.permute.xlu2 %254 }
  0xb2   :  { %v470_v36 = vpop.f32.mrf.mxu3 }
  0xb3   :  { %v480_v60 = vmax.f32 %v408_v58, 0.0 }
  0xb5   :  { %v2095_v1 = vpack.c.bf16 %v480_v60, %v479_v59  ;;  %1171 = vperm.xlu2 %1714, %v1121_v61  }
  0xb6   :  { %1166 = vperm.xlu1 %1713, %v1120_v62   ;;  %1161 = vperm.xlu0 %1712, %v1119_v63  }
  0xb8   :  { %v410_v4 = vpop.f32.mrf.mxu0  ;;  %v2125_v22 = vpop.permute.xlu0 %219 }
  0xb9   :  { %v411_v6 = vadd.f32 %v410_v4, %v1996_v12  ;;  %v2117_v12 = vpop.permute.xlu1 %209  ;;  %v230_v61 = vpop.permute.xlu2 %229 }
  0xba   :  { %v472_v57 = vpop.f32.mrf.mxu3 }
  0xbb   :  { %1512 = vmatmul.msk.bf16.gmra.mxu0 %vm337_vm0, %v1656_v3  ;;  %v481_v17 = vmax.f32 %v411_v6, 0.0  ;;  %v473_v59 = vadd.f32 %v472_v57, %v255_v37  ;;  %v461_v3 = vadd.f32 %v2076_v53, %v230_v61  ;;  %v1134_v53 = vld [vmem:[%s2625_s5 + $0x88] sm:$0xff]  ;;  %v1143_v37 = vld [vmem:[%s2625_s5 + $0xd0] sm:$0xff] }
  0xbd   :  { %1186 = vperm.xlu2 %1714, %v1124_v8   ;;  %v506_v62 = vmax.f32 %v473_v59, 0.0 }
  0xbe   :  { %1181 = vperm.xlu1 %1713, %v1123_v9   ;;  %1176 = vperm.xlu0 %1712, %v1122_v10  }
  0xc0   :  { %v412_v13 = vpop.f32.mrf.mxu0  ;;  %v240_v39 = vpop.permute.xlu0 %239 }
  0xc1   :  { %v413_v14 = vadd.f32 %v412_v13, %v2008_v16  ;;  %v250_v30 = vpop.permute.xlu1 %249  ;;  %v466_v55 = vadd.f32 %v465_v11, %v240_v39  ;;  %v1136_v11 = vld [vmem:[%s2625_s5 + $0x98] sm:$0xff]  ;;  %v1135_v13 = vld [vmem:[%s2625_s5 + $0x90] sm:$0xff] }
  0xc2   :  { %v471_v43 = vadd.f32 %v470_v36, %v250_v30  ;;  %v1141_v30 = vld [vmem:[%s2625_s5 + $0xc0] sm:$0xff]  ;;  %v1144_v36 = vld [vmem:[%s2625_s5 + $0xd8] sm:$0xff] }
  0xc3   :  { %v482_v19 = vmax.f32 %v413_v14, 0.0  ;;  %v503_v8 = vmax.f32 %v466_v55, 0.0  ;;  %v501_v14 = vmax.f32 %v461_v3, 0.0  ;;  %v1411_v55 = vld [vmem:[#allocation2] sm:$0x1] }
  0xc5   :  { %v2133_v16 = vpack.c.bf16 %v482_v19, %v481_v17  ;;  %1201 = vperm.xlu2 %1714, %v1127_v21  }
  0xc6   :  { %1196 = vperm.xlu1 %1713, %v1126_v23   ;;  %1191 = vperm.xlu0 %1712, %v1125_v24   ;;  %v1139_v23 = vld [vmem:[%s2625_s5 + $0xb0] sm:$0xff]  ;;  %v1138_v24 = vld [vmem:[%s2625_s5 + $0xa8] sm:$0xff] }
  0xc8   :  { %v415_v29 = vpop.f32.mrf.mxu0  ;;  %v235_v63 = vpop.permute.xlu0 %234 }
  0xc9   :  { %v416_v40 = vadd.f32 %v415_v29, %v2010_v18  ;;  %v245_v51 = vpop.permute.xlu1 %244  ;;  %v1131_v18 = vld [vmem:[%s2625_s5 + $0x70] sm:$0xff]  ;;  %v463_v6 = vadd.f32 %v2093_v0, %v235_v63  ;;  %v1142_v29 = vld [vmem:[%s2625_s5 + $0xc8] sm:$0xff] }
  0xca   :  { %v468_v58 = vadd.f32 %v467_v25, %v245_v51  ;;  %v1137_v25 = vld [vmem:[%s2625_s5 + $0xa0] sm:$0xff] }
  0xcb   :  { %1513 = vmatmul.msk.bf16.gmra.mxu0 %vm337_vm0, %v1657_v27  ;;  %v483_v47 = vmax.f32 %v416_v40, 0.0  ;;  %v502_v0 = vmax.f32 %v463_v6, 0.0  ;;  %v1148_v40 = vld [vmem:[%s2625_s5 + $0xf8] sm:$0xff] }
  0xcc   :  { %v504_v9 = vmax.f32 %v468_v58, 0.0 }
  0xcd   :  { %1216 = vperm.xlu2 %1714, %v1130_v32   ;;  %v2178_v21 = vpack.c.bf16 %v502_v0, %v501_v14  ;;  %v1140_v32 = vld [vmem:[%s2625_s5 + $0xb8] sm:$0xff] }
  0xce   :  { %1211 = vperm.xlu1 %1713, %v1129_v34   ;;  %1206 = vperm.xlu0 %1712, %v1128_v35   ;;  %v2175_v17 = vpack.c.bf16 %v504_v9, %v503_v8  ;;  %v1145_v35 = vld [vmem:[%s2625_s5 + $0xe0] sm:$0xff] }
  0xd0   :  { %v417_v41 = vpop.f32.mrf.mxu0 }
  0xd1   :  { %v418_v42 = vadd.f32 %v417_v41, %v2012_v20  ;;  %v505_v20 = vmax.f32 %v471_v43, 0.0  ;;  %v1147_v41 = vld [vmem:[%s2625_s5 + $0xf0] sm:$0xff] }
  0xd3   :  { %v484_v48 = vmax.f32 %v418_v42, 0.0  ;;  %v2163_v10 = vpack.c.bf16 %v506_v62, %v505_v20  ;;  %v1146_v42 = vld [vmem:[%s2625_s5 + $0xe8] sm:$0xff] }
  0xd5   :  { %v2159_v60 = vpack.c.bf16 %v484_v48, %v483_v47  ;;  %1231 = vperm.xlu2 %1714, %v1133_v49   ;;  %996 = vmatpush.bf16.msra.mxu2 %v2163_v10 }
  0xd6   :  { %1226 = vperm.xlu1 %1713, %v1132_v52   ;;  %1221 = vperm.xlu0 %1712, %v1131_v18  }
  0xd8   :  { %v420_v4 = vpop.f32.mrf.mxu0 }
  0xd9   :  { %997 = vmatpush.bf16.msra.mxu2 %v2175_v17  ;;  %v421_v59 = vadd.f32 %v420_v4, %v2028_v28 }
  0xdb   :  { %v485_v63 = vmax.f32 %v421_v59, 0.0 }
  0xdd   :  { %1246 = vperm.xlu2 %1714, %v1136_v11   ;;  %998 = vmatpush.bf16.msra.mxu2 %v2178_v21 }
  0xde   :  { %1241 = vperm.xlu1 %1713, %v1135_v13   ;;  %1236 = vperm.xlu0 %1712, %v1134_v53   ;;  %v1527_v13 = vld [vmem:[%s2623_s3 + $0x10] sm:$0xf]  ;;  %v1664_v53 = vld [vmem:[%s2623_s3 + $0x14] sm:$0xf0] }
  0xdf   :  { %v1528_v0 = vor.u32 %v1664_v53, %v1527_v13  ;;  %v1665_v53 = vld [vmem:[%s2623_s3 + $0x24] sm:$0xf] }
  0xe0   :  { %v422_v19 = vpop.f32.mrf.mxu0 }
  0xe1   :  { %v423_v57 = vadd.f32 %v422_v19, %v2030_v31 }
  0xe3   :  { %v486_v62 = vmax.f32 %v423_v57, 0.0 }
  0xe5   :  { %1261 = vperm.xlu2 %1714, %v1139_v23   ;;  %v1666_v23 = vld [vmem:[%s2623_s3 + $0x24] sm:$0xf0] }
  0xe6   :  { %1256 = vperm.xlu1 %1713, %v1138_v24   ;;  %1251 = vperm.xlu0 %1712, %v1137_v25   ;;  %v1631_v25 = vld [vmem:[%s2623_s3 + $0xe0] sm:$0xf] }
  0xe8   :  { %v425_v27 = vpop.f32.mrf.mxu0 }
  0xe9   :  { %v426_v51 = vadd.f32 %v425_v27, %v2036_v33  ;;  %v512_v33 = vpack.c.bf16 %v486_v62, %v485_v63  ;;  %v1690_v27 = vld [vmem:[%s2623_s3 + $0xe4] sm:$0xf0] }
  0xeb   :  { %v487_v61 = vmax.f32 %v426_v51, 0.0 }
  0xed   :  { %1276 = vperm.xlu2 %1714, %v1142_v29  }
  0xee   :  { %1271 = vperm.xlu1 %1713, %v1141_v30   ;;  %1266 = vperm.xlu0 %1712, %v1140_v32   ;;  %v1632_v30 = vor.u32 %v1690_v27, %v1631_v25  ;;  %v2364_v25 = vpop.permute.xlu0 %594 }
  0xf0   :  { %v427_v34 = vpop.f32.mrf.mxu0 }
  0xf1   :  { %v428_v48 = vadd.f32 %v427_v34, %v2044_v38 }
  0xf3   :  { %v488_v58 = vmax.f32 %v428_v48, 0.0 }
  0xf5   :  { %1291 = vperm.xlu2 %1714, %v1145_v35   ;;  %v513_v38 = vpack.c.bf16 %v488_v58, %v487_v61  ;;  %v1543_v35 = vld [vmem:[%s2623_s3 + $0x30] sm:$0xf] }
  0xf6   :  { %1286 = vperm.xlu1 %1713, %v1144_v36   ;;  %1281 = vperm.xlu0 %1712, %v1143_v37   ;;  %v1668_v36 = vld [vmem:[%s2623_s3 + $0x34] sm:$0xf0]  ;;  %v225_v37 = vpop.permute.xlu1 %224 }
  0xf8   :  { %v430_v39 = vpop.f32.mrf.mxu0 }
  0xf9   :  { %v431_v43 = vadd.f32 %v430_v39, %v2055_v44 }
  0xfb   :  { %v489_v52 = vmax.f32 %v431_v43, 0.0  ;;  %v1544_v43 = vor.u32 %v1668_v36, %v1543_v35 }
  0xfd   :  { %1306 = vperm.xlu2 %1714, %v1148_v40   ;;  %v1639_v40 = vld [vmem:[%s2623_s3 + $0xf0] sm:$0xf] }
  0xfe   :  { %1301 = vperm.xlu1 %1713, %v1147_v41   ;;  %1296 = vperm.xlu0 %1712, %v1146_v42   ;;  %v1692_v41 = vld [vmem:[%s2623_s3 + $0xf4] sm:$0xf0] }
  0xff   :  { %v1640_v51 = vor.u32 %v1692_v41, %v1639_v40  ;;  %v2382_v40 = vpop.permute.xlu0 %609 }
 0x100   :  { %v432_v47 = vpop.f32.mrf.mxu0 }
 0x101   :  { %v433_v49 = vadd.f32 %v432_v47, %v2059_v46 }
 0x103   :  { %v490_v18 = vmax.f32 %v433_v49, 0.0 }
 0x105   :  { %v514_v20 = vpack.c.bf16 %v490_v18, %v489_v52 }
 0x106   :  { %1414 = vperm.xlu0 %1712, %v1411_v55  }
 0x107   :  { %907 = vmatpush.bf16.msra.mxu1 %v514_v20  ;;  %1694 = vmatpush.bf16.msrb.mxu3 %v514_v20 }
 0x108   :  { %v435_v44 = vpop.f32.mrf.mxu0 }
 0x109   :  { %v436_v46 = vadd.f32 %v435_v44, %v2068_v50  ;;  %v1519_v50 = vld [vmem:[%s2623_s3] sm:$0xf] }
 0x10b   :  { %908 = vmatpush.bf16.msra.mxu1 %v513_v38  ;;  %1695 = vmatpush.bf16.msrb.mxu3 %v513_v38  ;;  %v491_v6 = vmax.f32 %v436_v46, 0.0  ;;  %v1685_v46 = vld [vmem:[%s2623_s3 + $0xc4] sm:$0xf] }
 0x10f   :  { %909 = vmatpush.bf16.msra.mxu1 %v512_v33  ;;  %1696 = vmatpush.bf16.msrb.mxu3 %v512_v33  ;;  %v1521_v33 = vld [vmem:[%s2623_s3 + $0x8] sm:$0xf0] }
 0x110   :  { %v437_v31 = vpop.f32.mrf.mxu0 }
 0x111   :  { %v438_v3 = vadd.f32 %v437_v31, %v2078_v54  ;;  %v1662_v54 = vld [vmem:[%s2623_s3 + $0x4] sm:$0xf0]  ;;  %v1617_v31 = vld [vmem:[%s2623_s3 + $0xc8] sm:$0xf0] }
 0x112   :  { %v1520_v9 = vor.u32 %v1662_v54, %v1519_v50  ;;  %v1663_v54 = vld [vmem:[%s2623_s3 + $0x14] sm:$0xf] }
 0x113   :  { %v492_v28 = vmax.f32 %v438_v3, 0.0  ;;  %910 = vmatpush.bf16.msra.mxu1 %v2159_v60  ;;  %1697 = vmatpush.bf16.msrb.mxu3 %v2159_v60 }
 0x115   :  { %v2227_v4 = vpack.c.bf16 %v492_v28, %v491_v6  ;;  %v1620_v6 = vor.u32 %v1685_v46, %v1617_v31  ;;  %v1559_v28 = vld [vmem:[%s2623_s3 + $0x50] sm:$0xf]  ;;  %v1569_v46 = vld [vmem:[%s2623_s3 + $0x68] sm:$0xf0] }
 0x117   :  { %911 = vmatpush.bf16.msra.mxu1 %v2133_v16  ;;  %1698 = vmatpush.bf16.msrb.mxu3 %v2133_v16  ;;  %v1615_v16 = vld [vmem:[%s2623_s3 + $0xc0] sm:$0xf] }
 0x118   :  { %v2231_v8 = vpop.f32.mrf.mxu0 }
 0x11b   :  { %912 = vmatpush.bf16.msra.mxu1 %v2095_v1  ;;  %1699 = vmatpush.bf16.msrb.mxu3 %v2095_v1  ;;  %v1686_v1 = vld [vmem:[%s2623_s3 + $0xc4] sm:$0xf0] }
 0x11c   :  { %v1616_v11 = vor.u32 %v1686_v1, %v1615_v16  ;;  %v1625_v16 = vld [vmem:[%s2623_s3 + $0xd8] sm:$0xf0] }
 0x11f   :  { %913 = vmatpush.bf16.msra.mxu1 %v2057_v45  ;;  %1700 = vmatpush.bf16.msrb.mxu3 %v2057_v45 }
 0x120   :  { %v442_v60 = vpop.f32.mrf.mxu0 }
 0x123   :  { %914 = vmatpush.bf16.msra.mxu1 %v2023_v26  ;;  %1701 = vmatpush.bf16.msrb.mxu3 %v2023_v26  ;;  %v1623_v26 = vld [vmem:[%s2623_s3 + $0xd0] sm:$0xf] }
 0x126   :  { %915 = vmatmul.bf16.vlgmr.msra.gmra.mxu1 %v1520_v9  ;;  %975 = vmatmul.bf16.vlgmr.msrb.gmra.mxu3 %v1616_v11  ;;  %v1567_v11 = vld [vmem:[%s2623_s3 + $0x60] sm:$0xf] }
 0x127   :  { %1702 = vmatpush.bf16.msra.mxu3 %v2163_v10  ;;  %v1688_v10 = vld [vmem:[%s2623_s3 + $0xd4] sm:$0xf0] }
 0x128   :  { %v445_v45 = vpop.f32.mrf.mxu0 }
 0x129   :  { %v446_v57 = vadd.f32 %v445_v45, %v2102_v5  ;;  %v1551_v5 = vld [vmem:[%s2623_s3 + $0x40] sm:$0xf]  ;;  %v1674_v45 = vld [vmem:[%s2623_s3 + $0x64] sm:$0xf0] }
 0x12a   :  { %v1568_v13 = vor.u32 %v1674_v45, %v1567_v11  ;;  %v1675_v11 = vld [vmem:[%s2623_s3 + $0x74] sm:$0xf]  ;;  %v1577_v45 = vld [vmem:[%s2623_s3 + $0x78] sm:$0xf0] }
 0x12b   :  { %1703 = vmatpush.bf16.msra.mxu3 %v2175_v17  ;;  %v1624_v17 = vor.u32 %v1688_v10, %v1623_v26  ;;  %v495_v61 = vmax.f32 %v446_v57, 0.0  ;;  %v1689_v26 = vld [vmem:[%s2623_s3 + $0xe4] sm:$0xf]  ;;  %v1633_v10 = vld [vmem:[%s2623_s3 + $0xe8] sm:$0xf0] }
 0x12c   :  { %v1680_v57 = vld [vmem:[%s2623_s3 + $0x94] sm:$0xf0] }
 0x12f   :  { %1704 = vmatpush.bf16.msra.mxu3 %v2178_v21  ;;  %v1535_v21 = vld [vmem:[%s2623_s3 + $0x20] sm:$0xf] }
 0x130   :  { %v447_v14 = vpop.f32.mrf.mxu0  ;;  %v1536_v29 = vor.u32 %v1666_v23, %v1535_v21  ;;  %v1575_v21 = vld [vmem:[%s2623_s3 + $0x70] sm:$0xf]  ;;  %v1676_v23 = vld [vmem:[%s2623_s3 + $0x74] sm:$0xf0] }
 0x131   :  { %v448_v52 = vadd.f32 %v447_v14, %v2105_v7  ;;  %v1537_v14 = vld [vmem:[%s2623_s3 + $0x28] sm:$0xf0]  ;;  %v1576_v27 = vor.u32 %v1676_v23, %v1575_v21  ;;  %v1677_v23 = vld [vmem:[%s2623_s3 + $0x84] sm:$0xf] }
 0x133   :  { %v496_v20 = vmax.f32 %v448_v52, 0.0 }
 0x135   :  { %v517_v44 = vpack.c.bf16 %v496_v20, %v495_v61  ;;  %v1561_v61 = vld [vmem:[%s2623_s3 + $0x58] sm:$0xf0] }
 0x136   :  { %920 = vmatmul.bf16.gmra.mxu1 %v1528_v0  ;;  %980 = vmatmul.bf16.gmra.mxu3 %v1624_v17  ;;  %v1540_v0 = vor.u32 %v1665_v53, %v1537_v14  ;;  %v1636_v17 = vor.u32 %v1689_v26, %v1633_v10 }
 0x138   :  { %v450_v19 = vpop.f32.mrf.mxu0 }
 0x139   :  { %v451_v47 = vadd.f32 %v450_v19, %v2117_v12  ;;  %v441_v12 = vadd.f32 %v2231_v8, %v2081_v56  ;;  %v1661_v56 = vld [vmem:[%s2623_s3 + $0x4] sm:$0xf]  ;;  %v1672_v8 = vld [vmem:[%s2623_s3 + $0x54] sm:$0xf0]  ;;  %v2354_v19 = vpop.permute.xlu2 %589 }
 0x13a   :  { %v1524_v3 = vor.u32 %v1661_v56, %v1521_v33  ;;  %v1560_v50 = vor.u32 %v1672_v8, %v1559_v28  ;;  %v1673_v33 = vld [vmem:[%s2623_s3 + $0x64] sm:$0xf] }
 0x13b   :  { %v497_v58 = vmax.f32 %v451_v47, 0.0  ;;  %v493_v62 = vmax.f32 %v441_v12, 0.0  ;;  %v1669_v47 = vld [vmem:[%s2623_s3 + $0x44] sm:$0xf]  ;;  %v1671_v12 = vld [vmem:[%s2623_s3 + $0x54] sm:$0xf]  ;;  %v1572_v28 = vor.u32 %v1673_v33, %v1569_v46 }
 0x140   :  { %v452_v24 = vpop.f32.mrf.mxu0 }
 0x141   :  { %v2378_v35 = vpop.permute.xlu2 %604 }
 0x146   :  { %925 = vmatmul.bf16.gmra.mxu1 %v1536_v29  ;;  %985 = vmatmul.bf16.gmra.mxu3 %v1632_v30  ;;  %v1667_v29 = vld [vmem:[%s2623_s3 + $0x34] sm:$0xf]  ;;  %v1545_v30 = vld [vmem:[%s2623_s3 + $0x38] sm:$0xf0] }
 0x147   :  { %v1548_v36 = vor.u32 %v1667_v29, %v1545_v30 }
 0x148   :  { %v455_v32 = vpop.f32.mrf.mxu0 }
 0x149   :  { %v456_v34 = vadd.f32 %v455_v32, %v2125_v22  ;;  %v453_v22 = vadd.f32 %v452_v24, %v2120_v15  ;;  %v443_v15 = vadd.f32 %v442_v60, %v2097_v2  ;;  %v1670_v2 = vld [vmem:[%s2623_s3 + $0x44] sm:$0xf0]  ;;  %v1529_v60 = vld [vmem:[%s2623_s3 + $0x18] sm:$0xf0]  ;;  %v2362_v24 = vpop.permute.xlu1 %599  ;;  %v1691_v32 = vld [vmem:[%s2623_s3 + $0xf4] sm:$0xf]  ;;  %v2384_v41 = vpop.permute.xlu2 %619 }
 0x14a   :  { %v1552_v63 = vor.u32 %v1670_v2, %v1551_v5  ;;  %v1532_v1 = vor.u32 %v1663_v54, %v1529_v60 }
 0x14b   :  { %v499_v48 = vmax.f32 %v456_v34, 0.0  ;;  %v498_v18 = vmax.f32 %v453_v22, 0.0  ;;  %v494_v7 = vmax.f32 %v443_v15, 0.0  ;;  %v1641_v34 = vld [vmem:[%s2623_s3 + $0xf8] sm:$0xf0] }
 0x14c   :  { %v1583_v22 = vld [vmem:[%s2623_s3 + $0x80] sm:$0xf] }
 0x14d   :  { %v518_v59 = vpack.c.bf16 %v498_v18, %v497_v58  ;;  %v516_v38 = vpack.c.bf16 %v494_v7, %v493_v62  ;;  %v1564_v7 = vor.u32 %v1671_v12, %v1561_v61 }
 0x150   :  { %v457_v39 = vpop.f32.mrf.mxu0 }
 0x151   :  { %v458_v42 = vadd.f32 %v457_v39, %v225_v37  ;;  %v1644_v37 = vor.u32 %v1691_v32, %v1641_v34  ;;  %v2380_v39 = vpop.permute.xlu1 %614  ;;  %v2402_v18 = vpop.permute.xlu2 %634 }
 0x153   :  { %v500_v49 = vmax.f32 %v458_v42, 0.0  ;;  %v1678_v42 = vld [vmem:[%s2623_s3 + $0x84] sm:$0xf0] }
 0x155   :  { %v519_v55 = vpack.c.bf16 %v500_v49, %v499_v48  ;;  %v1553_v48 = vld [vmem:[%s2623_s3 + $0x48] sm:$0xf0] }
 0x156   :  { %930 = vmatmul.bf16.gmra.mxu1 %v1544_v43  ;;  %990 = vmatmul.bf16.gmra.mxu3 %v1640_v51  ;;  %v1584_v43 = vor.u32 %v1678_v42, %v1583_v22  ;;  %v2400_v51 = vpop.permute.xlu0 %624  ;;  %v1556_v52 = vor.u32 %v1669_v47, %v1553_v48  ;;  %v1679_v47 = vld [vmem:[%s2623_s3 + $0x94] sm:$0xf]  ;;  %v1593_v48 = vld [vmem:[%s2623_s3 + $0x98] sm:$0xf0] }
 0x157   :  { %999 = vmatpush.bf16.msra.mxu2 %v519_v55  ;;  %1705 = vmatpush.bf16.msra.mxu3 %v519_v55  ;;  %v1591_v55 = vld [vmem:[%s2623_s3 + $0x90] sm:$0xf] }
 0x158   :  { %v1592_v20 = vor.u32 %v1680_v57, %v1591_v55 }
 0x159   :  { %v2398_v49 = vpop.permute.xlu1 %629 }
 0x15b   :  { %1000 = vmatpush.bf16.msra.mxu2 %v518_v59  ;;  %1706 = vmatpush.bf16.msra.mxu3 %v518_v59  ;;  %v2414_v59 = vpop.permute.xlu2 %649 }
 0x15e   :  { %v2412_v15 = vpop.permute.xlu0 %639 }
 0x15f   :  { %1001 = vmatpush.bf16.msra.mxu2 %v517_v44  ;;  %1707 = vmatpush.bf16.msra.mxu3 %v517_v44 }
 0x161   :  { %v2410_v58 = vpop.permute.xlu1 %644 }
 0x163   :  { %1002 = vmatpush.bf16.msra.mxu2 %v516_v38  ;;  %1708 = vmatpush.bf16.msra.mxu3 %v516_v38  ;;  %v2426_v2 = vpop.permute.xlu2 %664  ;;  %v1599_v38 = vld [vmem:[%s2623_s3 + $0xa0] sm:$0xf] }
 0x166   :  { %935 = vmatmul.bf16.gmra.mxu1 %v1552_v63  ;;  %v2424_v62 = vpop.permute.xlu0 %654  ;;  %v1682_v63 = vld [vmem:[%s2623_s3 + $0xa4] sm:$0xf0] }
 0x167   :  { %1003 = vmatpush.bf16.msra.mxu2 %v2227_v4  ;;  %1709 = vmatpush.bf16.msra.mxu3 %v2227_v4  ;;  %v1687_v4 = vld [vmem:[%s2623_s3 + $0xd4] sm:$0xf]  ;;  %v1600_v56 = vor.u32 %v1682_v63, %v1599_v38 }
 0x168   :  { %v1628_v9 = vor.u32 %v1687_v4, %v1625_v16  ;;  %v1607_v4 = vld [vmem:[%s2623_s3 + $0xb0] sm:$0xf]  ;;  %v1684_v16 = vld [vmem:[%s2623_s3 + $0xb4] sm:$0xf0] }
 0x169   :  { %v2422_v44 = vpop.permute.xlu1 %659 }
 0x16a   :  { %1004 = vmatmul.bf16.vlgmr.msra.gmra.mxu2 %v1524_v3  ;;  %1064 = vmatmul.bf16.vlgmr.msra.gmra.mxu3 %v1620_v6 }
 0x16b   :  { %v2444_v8 = vpop.permute.xlu2 %679 }
 0x16e   :  { %v2442_v3 = vpop.permute.xlu0 %669 }
 0x171   :  { %v2440_v31 = vpop.permute.xlu1 %674 }
 0x176   :  { %940 = vmatmul.bf16.gmra.mxu1 %v1560_v50  ;;  %v2448_v54 = vpop.permute.xlu0 %684 }
 0x179   :  { %v2446_v50 = vpop.permute.xlu1 %689 }
 0x17a   :  { %1009 = vmatmul.bf16.gmra.mxu2 %v1532_v1  ;;  %1069 = vmatmul.bf16.gmra.mxu3 %v1628_v9  ;;  %v2456_v1 = vpop.permute.xlu2 %694  ;;  %v1608_v9 = vor.u32 %v1684_v16, %v1607_v4 }
 0x17e   :  { %v2466_v14 = vpop.permute.xlu0 %699 }
 0x181   :  { %v2464_v53 = vpop.permute.xlu1 %704 }
 0x182   :  { %v2468_v10 = vpop.permute.xlu2 %709 }
 0x186   :  { %945 = vmatmul.bf16.gmra.mxu1 %v1568_v13  ;;  %v1580_v13 = vor.u32 %v1675_v11, %v1577_v45 }
 0x18a   :  { %1014 = vmatmul.bf16.gmra.mxu2 %v1540_v0  ;;  %1074 = vmatmul.bf16.gmra.mxu3 %v1636_v17  ;;  %v2470_v0 = vpop.permute.xlu1 %719  ;;  %v2472_v17 = vpop.permute.xlu0 %714 }
 0x18b   :  { %v2480_v29 = vpop.permute.xlu2 %724 }
 0x192   :  { %v2482_v32 = vpop.permute.xlu1 %734  ;;  %v2484_v34 = vpop.permute.xlu0 %729 }
 0x196   :  { %950 = vmatmul.bf16.gmra.mxu1 %v1576_v27  ;;  %v1585_v27 = vld [vmem:[%s2623_s3 + $0x88] sm:$0xf0] }
 0x197   :  { %v1588_v30 = vor.u32 %v1677_v23, %v1585_v27  ;;  %v1601_v23 = vld [vmem:[%s2623_s3 + $0xa8] sm:$0xf0] }
 0x19a   :  { %1019 = vmatmul.bf16.gmra.mxu2 %v1548_v36  ;;  %1079 = vmatmul.bf16.gmra.mxu3 %v1644_v37  ;;  %v2496_v61 = vpop.permute.xlu0 %744 }
 0x19b   :  { %2628 = vst [vmem:[#allocation6_spill] sm:$0xff] %v2496_v61 }
 0x1a3   :  { %v916_v5 = vpop.f32.mrf.mxu1 }
 0x1a4   :  { %v917_v36 = vadd.f32 %v916_v5, %v2354_v19  ;;  %v1596_v19 = vor.u32 %v1679_v47, %v1593_v48 }
 0x1a6   :  { %955 = vmatmul.bf16.gmra.mxu1 %v1584_v43  ;;  %v2487_v43 = vpop.permute.xlu2 %739 }
 0x1aa   :  { %1024 = vmatmul.bf16.gmra.mxu2 %v1556_v52 }
 0x1ab   :  { %v918_v6 = vpop.f32.mrf.mxu1 }
 0x1ac   :  { %v919_v52 = vadd.f32 %v918_v6, %v2364_v25 }
 0x1ae   :  { %v1157_v63 = vpop.permute.xlu2 %1156 }
 0x1b3   :  { %v921_v60 = vpop.f32.mrf.mxu1 }
 0x1b4   :  { %v922_v33 = vadd.f32 %v921_v60, %v2362_v24 }
 0x1b6   :  { %960 = vmatmul.bf16.gmra.mxu1 %v1592_v20  ;;  %v1152_v20 = vpop.permute.xlu1 %1151 }
 0x1ba   :  { %1029 = vmatmul.bf16.gmra.mxu2 %v1564_v7 }
 0x1bb   :  { %v923_v26 = vpop.f32.mrf.mxu1 }
 0x1bc   :  { %v924_v24 = vadd.f32 %v923_v26, %v2378_v35  ;;  %v1172_v35 = vpop.permute.xlu2 %1171 }
 0x1be   :  { %v1167_v47 = vpop.permute.xlu1 %1166 }
 0x1c3   :  { %v926_v21 = vpop.f32.mrf.mxu1 }
 0x1c6   :  { %965 = vmatmul.bf16.gmra.mxu1 %v1600_v56 }
 0x1ca   :  { %1034 = vmatmul.bf16.gmra.mxu2 %v1572_v28 }
 0x1cb   :  { %v928_v37 = vpop.f32.mrf.mxu1 }
 0x1d3   :  { %v931_v7 = vpop.f32.mrf.mxu1 }
 0x1d6   :  { %970 = vmatmul.bf16.gmra.mxu1 %v1608_v9  ;;  %v1162_v9 = vpop.permute.xlu0 %1161 }
 0x1da   :  { %1039 = vmatmul.bf16.gmra.mxu2 %v1580_v13  ;;  %v1681_v13 = vld [vmem:[%s2623_s3 + $0xa4] sm:$0xf] }
 0x1db   :  { %v933_v11 = vpop.f32.mrf.mxu1 }
 0x1ea   :  { %1044 = vmatmul.bf16.gmra.mxu2 %v1588_v30 }
 0x1ed   :  { %v1005_v22 = vpop.f32.mrf.mxu2 }
 0x1ee   :  { %v1006_v42 = vadd.f32 %v1005_v22, %v917_v36  ;;  %v1604_v22 = vor.u32 %v1681_v13, %v1601_v23 }
 0x1f0   :  { %v1085_v55 = vmax.f32 %v1006_v42, 0.0 }
 0x1f2   :  { %v1309_v5 = vmul.f32 %v1152_v20, %v1085_v55  ;;  %v927_v55 = vadd.f32 %v926_v21, %v2382_v40 }
 0x1f4   :  { %v1342_v46 = vsel %vm1341_vm1, %v1309_v5, 0.0 }
 0x1f5   :  { %v1007_v57 = vpop.f32.mrf.mxu2 }
 0x1f6   :  { %v1008_v12 = vadd.f32 %v1007_v57, %v919_v52  ;;  %v936_v52 = vpop.f32.mrf.mxu1 }
 0x1f8   :  { %v1086_v38 = vmax.f32 %v1008_v12, 0.0 }
 0x1fa   :  { %v1310_v56 = vmul.f32 %v1157_v63, %v1086_v38  ;;  %1049 = vmatmul.bf16.gmra.mxu2 %v1596_v19  ;;  %v1683_v38 = vld [vmem:[%s2623_s3 + $0xb4] sm:$0xf]  ;;  %v1609_v63 = vld [vmem:[%s2623_s3 + $0xb8] sm:$0xf0]  ;;  %s1742_s3 = smov [#allocation3]  }
 0x1fb   :  { %s1426_s29 = sshll.u32 %s1742_s3, 4  ;;  %s1427_s29 = int_to_ptr.vmem [resolvable:$true] %s1426_s29 }
 0x1fc   :  { %v1343_v25 = vsel %vm1341_vm1, %v1310_v56, 0.0  ;;  %v929_v56 = vadd.f32 %v928_v37, %v2380_v39 }
 0x1fd   :  { %v1344_v6 = vadd.f32 %v1343_v25, %v1342_v46  ;;  %v1010_v28 = vpop.f32.mrf.mxu2 }
 0x1fe   :  { %v1011_v4 = vadd.f32 %v1010_v28, %v922_v33  ;;  %v938_v21 = vpop.f32.mrf.mxu1 }
 0x200   :  { %v1087_v16 = vmax.f32 %v1011_v4, 0.0  ;;  %v1177_v4 = vpop.permute.xlu0 %1176 }
 0x202   :  { %v1311_v45 = vmul.f32 %v1162_v9, %v1087_v16  ;;  %v2519_v16 = vpop.f32.mrf.mxu3 }
 0x204   :  { %v1345_v60 = vsel %vm1341_vm1, %v1311_v45, 0.0  ;;  %v932_v45 = vadd.f32 %v931_v7, %v2384_v41  ;;  %v1187_v41 = vpop.permute.xlu2 %1186 }
 0x205   :  { %v1346_v27 = vadd.f32 %v1345_v60, %v1344_v6  ;;  %v1012_v30 = vpop.f32.mrf.mxu2  ;;  %v1612_v6 = vor.u32 %v1683_v38, %v1609_v63 }
 0x206   :  { %v1013_v36 = vadd.f32 %v1012_v30, %v924_v24  ;;  %v941_v37 = vpop.f32.mrf.mxu1 }
 0x208   :  { %v1088_v42 = vmax.f32 %v1013_v36, 0.0 }
 0x20a   :  { %v1312_v48 = vmul.f32 %v1167_v47, %v1088_v42  ;;  %1054 = vmatmul.bf16.gmra.mxu2 %v1604_v22  ;;  %v2523_v36 = vpop.f32.mrf.mxu3  ;;  %v934_v22 = vadd.f32 %v933_v11, %v2400_v51  ;;  %v1192_v51 = vpop.permute.xlu0 %1191 }
 0x20c   :  { %v1347_v57 = vsel %vm1341_vm1, %v1312_v48, 0.0 }
 0x20d   :  { %v1348_v20 = vadd.f32 %v1347_v57, %v1346_v27  ;;  %v1015_v12 = vpop.f32.mrf.mxu2  ;;  %v1182_v27 = vpop.permute.xlu1 %1181 }
 0x20e   :  { %v1016_v19 = vadd.f32 %v1015_v12, %v927_v55  ;;  %v943_v7 = vpop.f32.mrf.mxu1  ;;  %v937_v12 = vadd.f32 %v936_v52, %v2398_v49 }
 0x210   :  { %v1089_v5 = vmax.f32 %v1016_v19, 0.0 }
 0x212   :  { %v1313_v26 = vmul.f32 %v1172_v35, %v1089_v5  ;;  %v2529_v5 = vpop.f32.mrf.mxu3 }
 0x214   :  { %v1349_v40 = vsel %vm1341_vm1, %v1313_v26, 0.0 }
 0x215   :  { %v1350_v33 = vadd.f32 %v1349_v40, %v1348_v20  ;;  %v1017_v46 = vpop.f32.mrf.mxu2  ;;  %v939_v40 = vadd.f32 %v938_v21, %v2402_v18  ;;  %v1197_v52 = vpop.permute.xlu1 %1196 }
 0x216   :  { %v1018_v25 = vadd.f32 %v1017_v46, %v929_v56  ;;  %v946_v56 = vpop.f32.mrf.mxu1  ;;  %v1202_v18 = vpop.permute.xlu2 %1201 }
 0x218   :  { %v1090_v28 = vmax.f32 %v1018_v25, 0.0 }
 0x21a   :  { %v1314_v9 = vmul.f32 %v1177_v4, %v1090_v28  ;;  %1059 = vmatmul.bf16.gmra.mxu2 %v1612_v6  ;;  %v2533_v28 = vpop.f32.mrf.mxu3 }
 0x21c   :  { %v1351_v13 = vsel %vm1341_vm1, %v1314_v9, 0.0  ;;  %v942_v9 = vadd.f32 %v941_v37, %v2412_v15  ;;  %v1207_v37 = vpop.permute.xlu0 %1206 }
 0x21d   :  { %v1352_v23 = vadd.f32 %v1351_v13, %v1350_v33  ;;  %v1020_v24 = vpop.f32.mrf.mxu2 }
 0x21e   :  { %v1021_v39 = vadd.f32 %v1020_v24, %v932_v45  ;;  %v948_v13 = vpop.f32.mrf.mxu1 }
 0x220   :  { %v1091_v60 = vmax.f32 %v1021_v39, 0.0 }
 0x222   :  { %v1315_v30 = vmul.f32 %v1182_v27, %v1091_v60  ;;  %v2537_v21 = vpop.f32.mrf.mxu3 }
 0x224   :  { %v1353_v42 = vsel %vm1341_vm1, %v1315_v30, 0.0  ;;  %v944_v30 = vadd.f32 %v943_v7, %v2410_v58  ;;  %v1212_v58 = vpop.permute.xlu1 %1211 }
 0x225   :  { %v1354_v47 = vadd.f32 %v1353_v42, %v1352_v23  ;;  %v1022_v48 = vpop.f32.mrf.mxu2 }
 0x226   :  { %v1023_v55 = vadd.f32 %v1022_v48, %v934_v22 }
 0x228   :  { %v1092_v57 = vmax.f32 %v1023_v55, 0.0  ;;  %v951_v55 = vpop.f32.mrf.mxu1 }
 0x22a   :  { %v1316_v20 = vmul.f32 %v1187_v41, %v1092_v57  ;;  %v2541_v41 = vpop.f32.mrf.mxu3 }
 0x22c   :  { %v1355_v19 = vsel %vm1341_vm1, %v1316_v20, 0.0  ;;  %v947_v20 = vadd.f32 %v946_v56, %v2414_v59 }
 0x22d   :  { %v1356_v35 = vadd.f32 %v1355_v19, %v1354_v47  ;;  %v1025_v26 = vpop.f32.mrf.mxu2 }
 0x22e   :  { %v1026_v38 = vadd.f32 %v1025_v26, %v937_v12 }
 0x230   :  { %v1093_v63 = vmax.f32 %v1026_v38, 0.0  ;;  %v953_v7 = vpop.f32.mrf.mxu1 }
 0x232   :  { %v1317_v11 = vmul.f32 %v1192_v51, %v1093_v63 }
 0x234   :  { %v1357_v33 = vsel %vm1341_vm1, %v1317_v11, 0.0  ;;  %v2546_v11 = vpop.f32.mrf.mxu3 }
 0x235   :  { %v1358_v46 = vadd.f32 %v1357_v33, %v1356_v35  ;;  %v1027_v25 = vpop.f32.mrf.mxu2 }
 0x236   :  { %v1028_v6 = vadd.f32 %v1027_v25, %v939_v40 }
 0x238   :  { %v1094_v49 = vmax.f32 %v1028_v6, 0.0 }
 0x23a   :  { %v1318_v4 = vmul.f32 %v1197_v52, %v1094_v49 }
 0x23c   :  { %v1359_v45 = vsel %vm1341_vm1, %v1318_v4, 0.0  ;;  %v2550_v6 = vpop.f32.mrf.mxu3 }
 0x23d   :  { %v1360_v23 = vadd.f32 %v1359_v45, %v1358_v46  ;;  %v1030_v24 = vpop.f32.mrf.mxu2  ;;  %v956_v46 = vpop.f32.mrf.mxu1  ;;  %2629 = vst [vmem:[#allocation7_spill] sm:$0xff] %v2550_v6 }
 0x23e   :  { %v1031_v39 = vadd.f32 %v1030_v24, %v942_v9  ;;  %v1217_v24 = vpop.permute.xlu2 %1216 }
 0x240   :  { %v1095_v60 = vmax.f32 %v1031_v39, 0.0 }
 0x242   :  { %v1319_v27 = vmul.f32 %v1202_v18, %v1095_v60  ;;  %v1222_v18 = vpop.permute.xlu0 %1221 }
 0x244   :  { %v1361_v22 = vsel %vm1341_vm1, %v1319_v27, 0.0  ;;  %v2552_v49 = vpop.f32.mrf.mxu3  ;;  %v1227_v27 = vpop.permute.xlu1 %1226 }
 0x245   :  { %v1362_v42 = vadd.f32 %v1361_v22, %v1360_v23  ;;  %v1032_v47 = vpop.f32.mrf.mxu2  ;;  %v958_v59 = vpop.f32.mrf.mxu1 }
 0x246   :  { %v1033_v48 = vadd.f32 %v1032_v47, %v944_v30  ;;  %v1232_v22 = vpop.permute.xlu2 %1231  ;;  %v959_v61 = vadd.f32 %v958_v59, %v2440_v31 }
 0x248   :  { %v1096_v15 = vmax.f32 %v1033_v48, 0.0  ;;  %v949_v48 = vadd.f32 %v948_v13, %v2424_v62 }
 0x24a   :  { %v1320_v57 = vmul.f32 %v1207_v37, %v1096_v15  ;;  %v952_v15 = vadd.f32 %v951_v55, %v2422_v44 }
 0x24c   :  { %v1363_v12 = vsel %vm1341_vm1, %v1320_v57, 0.0  ;;  %v2554_v9 = vpop.f32.mrf.mxu3  ;;  %v1237_v57 = vpop.permute.xlu0 %1236 }
 0x24d   :  { %v1364_v19 = vadd.f32 %v1363_v12, %v1362_v42  ;;  %v1035_v35 = vpop.f32.mrf.mxu2  ;;  %v961_v4 = vpop.f32.mrf.mxu1  ;;  %v954_v12 = vadd.f32 %v953_v7, %v2426_v2 }
 0x24e   :  { %v1036_v26 = vadd.f32 %v1035_v35, %v947_v20  ;;  %v1242_v20 = vpop.permute.xlu1 %1241  ;;  %v962_v44 = vadd.f32 %v961_v4, %v2444_v8 }
 0x250   :  { %v1097_v38 = vmax.f32 %v1036_v26, 0.0 }
 0x252   :  { %v1321_v63 = vmul.f32 %v1212_v58, %v1097_v38  ;;  %v957_v38 = vadd.f32 %v956_v46, %v2442_v3 }
 0x254   :  { %v1365_v51 = vsel %vm1341_vm1, %v1321_v63, 0.0  ;;  %v2556_v39 = vpop.f32.mrf.mxu3  ;;  %v1252_v3 = vpop.permute.xlu0 %1251 }
 0x255   :  { %v2548_v40 = vadd.f32 %v1365_v51, %v1364_v19  ;;  %v1037_v33 = vpop.f32.mrf.mxu2  ;;  %v963_v23 = vpop.f32.mrf.mxu1 }
 0x256   :  { %v1038_v37 = vadd.f32 %v1037_v33, %v949_v48  ;;  %v1247_v51 = vpop.permute.xlu2 %1246  ;;  %v964_v2 = vadd.f32 %v963_v23, %v2448_v54 }
 0x258   :  { %v1098_v58 = vmax.f32 %v1038_v37, 0.0 }
 0x25a   :  { %v1322_v55 = vmul.f32 %v1217_v24, %v1098_v58 }
 0x25c   :  { %v2558_v42 = vpop.f32.mrf.mxu3  ;;  %v1367_v37 = vsel %vm1341_vm1, %v1322_v55, 0.0 }
 0x25d   :  { %v1040_v25 = vpop.f32.mrf.mxu2  ;;  %v966_v30 = vpop.f32.mrf.mxu1 }
 0x25e   :  { %v1041_v19 = vadd.f32 %v1040_v25, %v952_v15  ;;  %v967_v46 = vadd.f32 %v966_v30, %v2446_v50  ;;  %v1262_v24 = vpop.permute.xlu2 %1261  ;;  %v1368_v50 = vadd.f32 %v1367_v37, %v2548_v40  ;;  %v1267_v40 = vpop.permute.xlu0 %1266  ;;  %v982_v37 = vadd.f32 %v2529_v5, %v2470_v0 }
 0x25f   :  { %v987_v5 = vadd.f32 %v2537_v21, %v2484_v34  ;;  %v992_v34 = vadd.f32 %v2546_v11, %v2487_v43 }
 0x260   :  { %v1099_v62 = vmax.f32 %v1041_v19, 0.0 }
 0x262   :  { %v1323_v7 = vmul.f32 %v1222_v18, %v1099_v62 }
 0x264   :  { %v2564_v6 = vpop.f32.mrf.mxu3 }
 0x265   :  { %v1042_v56 = vpop.f32.mrf.mxu2  ;;  %v968_v35 = vpop.f32.mrf.mxu1 }
 0x266   :  { %v1043_v63 = vadd.f32 %v1042_v56, %v954_v12  ;;  %v969_v8 = vadd.f32 %v968_v35, %v2456_v1 }
 0x268   :  { %v1100_v33 = vmax.f32 %v1043_v63, 0.0 }
 0x26a   :  { %v1324_v12 = vmul.f32 %v1227_v27, %v1100_v33 }
 0x26c   :  { %v1371_v18 = vsel %vm1341_vm1, %v1324_v12, 0.0 }
 0x26d   :  { %v1045_v52 = vpop.f32.mrf.mxu2  ;;  %v971_v4 = vpop.f32.mrf.mxu1 }
 0x26e   :  { %v1046_v13 = vadd.f32 %v1045_v52, %v957_v38  ;;  %v1257_v52 = vpop.permute.xlu1 %1256  ;;  %v972_v38 = vadd.f32 %v971_v4, %v2466_v14 }
 0x270   :  { %v1101_v25 = vmax.f32 %v1046_v13, 0.0 }
 0x275   :  { %v1047_v45 = vpop.f32.mrf.mxu2 }
 0x276   :  { %v1048_v48 = vadd.f32 %v1047_v45, %v959_v61  ;;  %v1369_v61 = vsel %vm1341_vm1, %v1323_v7, 0.0  ;;  %v1325_v45 = vmul.f32 %v1232_v22, %v1101_v25  ;;  %v973_v7 = vpop.f32.mrf.mxu1  ;;  %v979_v25 = vadd.f32 %v2523_v36, %v2472_v17 }
 0x277   :  { %v974_v12 = vadd.f32 %v973_v7, %v2464_v53  ;;  %v984_v17 = vadd.f32 %v2533_v28, %v2480_v29  ;;  %v989_v29 = vadd.f32 %v2541_v41, %v2482_v32  ;;  %v2631_v32 = vld [vmem:[#allocation7_spill] sm:$0xff] }
 0x278   :  { %v1102_v31 = vmax.f32 %v1048_v48, 0.0  ;;  %v1373_v1 = vsel %vm1341_vm1, %v1325_v45, 0.0 }
 0x279   :  { %v1073_v53 = vadd.f32 %v2558_v42, %v984_v17 }
 0x27a   :  { %v1326_v30 = vmul.f32 %v1237_v57, %v1102_v31  ;;  %v977_v57 = vadd.f32 %v2519_v16, %v2468_v10 }
 0x27b   :  { %v1112_v42 = vmax.f32 %v1073_v53, 0.0 }
 0x27d   :  { %v1050_v60 = vpop.f32.mrf.mxu2 }
 0x27e   :  { %v1051_v15 = vadd.f32 %v1050_v60, %v962_v44  ;;  %v2573_v60 = vpop.f32.mrf.mxu3 }
 0x280   :  { %v1103_v54 = vmax.f32 %v1051_v15, 0.0  ;;  %v1066_v15 = vadd.f32 %v2552_v49, %v977_v57 }
 0x282   :  { %v1327_v35 = vmul.f32 %v1242_v20, %v1103_v54 }
 0x284   :  { %v1377_v33 = vsel %vm1341_vm1, %v1327_v35, 0.0 }
 0x285   :  { %v1052_v47 = vpop.f32.mrf.mxu2 }
 0x286   :  { %v1053_v59 = vadd.f32 %v1052_v47, %v964_v2  ;;  %v1370_v47 = vadd.f32 %v1369_v61, %v1368_v50  ;;  %v1272_v2 = vpop.permute.xlu1 %1271  ;;  %v1080_v10 = vpop.f32.mrf.mxu3  ;;  %v1076_v50 = vadd.f32 %v2564_v6, %v987_v5 }
 0x288   :  { %v1104_v27 = vmax.f32 %v1053_v59, 0.0  ;;  %v1372_v22 = vadd.f32 %v1371_v18, %v1370_v47 }
 0x28a   :  { %v1328_v62 = vmul.f32 %v1247_v51, %v1104_v27  ;;  %v1374_v55 = vadd.f32 %v1373_v1, %v1372_v22  ;;  %v2630_v1 = vld [vmem:[#allocation6_spill] sm:$0xff] }
 0x28b   :  { %v994_v41 = vadd.f32 %v2631_v32, %v2630_v1 }
 0x28c   :  { %v1379_v51 = vsel %vm1341_vm1, %v1328_v62, 0.0 }
 0x28d   :  { %v1055_v26 = vpop.f32.mrf.mxu2 }
 0x28e   :  { %v1056_v23 = vadd.f32 %v1055_v26, %v967_v46  ;;  %v1375_v26 = vsel %vm1341_vm1, %v1326_v30, 0.0  ;;  %v1287_v30 = vpop.permute.xlu1 %1286  ;;  %v1082_v35 = vpop.f32.mrf.mxu3 }
 0x28f   :  { %v1376_v20 = vadd.f32 %v1375_v26, %v1374_v55  ;;  %v1081_v26 = vadd.f32 %v1080_v10, %v992_v34  ;;  %v1336_v11 = vmul.f32 %v1287_v30, %v1112_v42 }
 0x290   :  { %v1105_v58 = vmax.f32 %v1056_v23, 0.0  ;;  %v1282_v23 = vpop.permute.xlu0 %1281 }
 0x291   :  { %v1378_v16 = vadd.f32 %v1377_v33, %v1376_v20  ;;  %v1115_v57 = vmax.f32 %v1081_v26, 0.0 }
 0x292   :  { %v1329_v48 = vmul.f32 %v1252_v3, %v1105_v58  ;;  %v1068_v3 = vadd.f32 %v2554_v9, %v979_v25 }
 0x293   :  { %v1380_v36 = vadd.f32 %v1379_v51, %v1378_v16 }
 0x294   :  { %v1381_v31 = vsel %vm1341_vm1, %v1329_v48, 0.0  ;;  %v1110_v61 = vmax.f32 %v1068_v3, 0.0 }
 0x295   :  { %v1057_v56 = vpop.f32.mrf.mxu2  ;;  %v1382_v9 = vadd.f32 %v1381_v31, %v1380_v36 }
 0x296   :  { %v1058_v19 = vadd.f32 %v1057_v56, %v969_v8  ;;  %v1277_v56 = vpop.permute.xlu2 %1276  ;;  %v1109_v8 = vmax.f32 %v1066_v15, 0.0  ;;  %v1302_v20 = vpop.permute.xlu1 %1301 }
 0x297   :  { %v1334_v27 = vmul.f32 %v1277_v56, %v1110_v61  ;;  %v1339_v51 = vmul.f32 %v1302_v20, %v1115_v57 }
 0x298   :  { %v1106_v13 = vmax.f32 %v1058_v19, 0.0  ;;  %v1078_v19 = vadd.f32 %v2573_v60, %v989_v29  ;;  %v1297_v33 = vpop.permute.xlu0 %1296 }
 0x299   :  { %v1391_v43 = vsel %vm1341_vm1, %v1334_v27, 0.0  ;;  %v1401_v3 = vsel %vm1341_vm1, %v1339_v51, 0.0 }
 0x29a   :  { %v1330_v46 = vmul.f32 %v1257_v52, %v1106_v13  ;;  %v1071_v52 = vadd.f32 %v2556_v39, %v982_v37  ;;  %v1114_v13 = vmax.f32 %v1078_v19, 0.0 }
 0x29c   :  { %v1383_v4 = vsel %vm1341_vm1, %v1330_v46, 0.0  ;;  %v1111_v39 = vmax.f32 %v1071_v52, 0.0 }
 0x29d   :  { %v1060_v63 = vpop.f32.mrf.mxu2  ;;  %v1384_v28 = vadd.f32 %v1383_v4, %v1382_v9 }
 0x29e   :  { %v1061_v44 = vadd.f32 %v1060_v63, %v972_v38  ;;  %v1292_v38 = vpop.permute.xlu2 %1291  ;;  %v1335_v22 = vmul.f32 %v1282_v23, %v1111_v39  ;;  %v1113_v63 = vmax.f32 %v1076_v50, 0.0 }
 0x2a0   :  { %v1107_v14 = vmax.f32 %v1061_v44, 0.0  ;;  %v1083_v44 = vadd.f32 %v1082_v35, %v994_v41  ;;  %v1337_v55 = vmul.f32 %v1292_v38, %v1113_v63  ;;  %v1415_v52 = vpop.permute.xlu0 %1414 }
 0x2a2   :  { %v1331_v59 = vmul.f32 %v1262_v24, %v1107_v14  ;;  %v1333_v24 = vmul.f32 %v1272_v2, %v1109_v8  ;;  %v1395_v14 = vsel %vm1341_vm1, %v1336_v11, 0.0  ;;  %v1338_v2 = vmul.f32 %v1297_v33, %v1114_v13 }
 0x2a3   :  { %v1116_v7 = vmax.f32 %v1083_v44, 0.0  ;;  %v1397_v15 = vsel %vm1341_vm1, %v1337_v55, 0.0 }
 0x2a4   :  { %v1385_v45 = vsel %vm1341_vm1, %v1331_v59, 0.0  ;;  %v1389_v6 = vsel %vm1341_vm1, %v1333_v24, 0.0  ;;  %v1399_v37 = vsel %vm1341_vm1, %v1338_v2, 0.0 }
 0x2a5   :  { %v1062_v49 = vpop.f32.mrf.mxu2  ;;  %v1386_v21 = vadd.f32 %v1385_v45, %v1384_v28 }
 0x2a6   :  { %v1063_v0 = vadd.f32 %v1062_v49, %v974_v12  ;;  %v1307_v46 = vpop.permute.xlu2 %1306 }
 0x2a7   :  { %v1340_v10 = vmul.f32 %v1307_v46, %v1116_v7 }
 0x2a8   :  { %v1108_v54 = vmax.f32 %v1063_v0, 0.0  ;;  %v1417_v0 = vperm.slane %v1415_v52, 0 }
 0x2a9   :  { %v1403_v31 = vsel %vm1341_vm1, %v1340_v10, 0.0 }
 0x2aa   :  { %v1332_v18 = vmul.f32 %v1267_v40, %v1108_v54  ;;  %v1393_v40 = vsel %vm1341_vm1, %v1335_v22, 0.0 }
 0x2ac   :  { %v1387_v47 = vsel %vm1341_vm1, %v1332_v18, 0.0 }
 0x2ad   :  { %v1388_v58 = vadd.f32 %v1387_v47, %v1386_v21 }
 0x2af   :  { %v1390_v62 = vadd.f32 %v1389_v6, %v1388_v58 }
 0x2b1   :  { %v1392_v60 = vadd.f32 %v1391_v43, %v1390_v62 }
 0x2b3   :  { %v1394_v48 = vadd.f32 %v1393_v40, %v1392_v60 }
 0x2b5   :  { %v1396_v25 = vadd.f32 %v1395_v14, %v1394_v48 }
 0x2b7   :  { %v1398_v56 = vadd.f32 %v1397_v15, %v1396_v25 }
 0x2b9   :  { %v1400_v16 = vadd.f32 %v1399_v37, %v1398_v56 }
 0x2bb   :  { %v1402_v12 = vadd.f32 %v1401_v3, %v1400_v16 }
 0x2bd   :  { %v1404_v59 = vadd.f32 %v1403_v31, %v1402_v12 }
 0x2bf   :  { %v1405_v17 = vrot.slane %v1404_v59, 4 }
 0x2c1   :  { %v1406_v36 = vadd.f32 %v1405_v17, %v1404_v59 }
 0x2c3   :  { %v1407_v49 = vrot.slane %v1406_v36, 2 }
 0x2c5   :  { %v1408_v8 = vadd.f32 %v1407_v49, %v1406_v36 }
 0x2c7   :  { %v1409_v4 = vrot.slane %v1408_v8, 1 }
 0x2c9   :  { %v1410_v5 = vadd.f32 %v1409_v4, %v1408_v8 }
 0x2cb   :  { %v1418_v9 = vadd.f32 %v1417_v0, %v1410_v5 }
 0x2cd   :  { %1420 = vst.msk [vmem:[#allocation3] sm:$0x1] %vm1419_vm2, %v1418_v9 }
 0x2ce   :  { %1431 = dma.vmem_to_hbm [thread:$0]  %s1427_s29, 16, %s1429_s9, [#allocation4]  }
 0x2cf   :  { %1739 = dma.done.wait [#allocation4], 16  }
 0x2d0   :  { %1740 = vsyncadd [#allocation4], 4294967280 }
 0x2d1   :  { %1436 = vsyncpa [#allocation4], 1 }

</bundles_post_ra>
